<compile_context>
chip_gen: v5e
topology: v5e:2x2
jax: 0.10.0
libtpu: 0.0.40
codegen_flags: <defaults>
</compile_context>

<pallas_src>
import functools

import jax
import jax.numpy as jnp
import numpy as np
from jax.experimental import pallas as pl
from jax.experimental.pallas import tpu as pltpu


# ---------------------------------------------------------------------------
# The fused Pallas kernel: whole forward = matmul -> relu -> matmul -> bias
# ---------------------------------------------------------------------------

_VMEM = pl.BlockSpec(memory_space=pltpu.MemorySpace.VMEM)

_SUBLANES = 8   # carry activations as 8 rows -> clean (8,128) vreg tiles
_LANE = 128


def _fused_forward_kernel(x_ref, a0_ref, bmat_ref, c_ref, out_ref):
    """out = relu(x_aug @ A0) @ B + C   (padded logits, [8, 128])."""
    h = jnp.dot(x_ref[...], a0_ref[...],
                preferred_element_type=jnp.float32)          # ChebConv_0 (+bias lane)
    h = jnp.maximum(h, 0.0)                                  # ReLU
    out_ref[...] = jnp.dot(h, bmat_ref[...],                 # pool + ChebConv_1 + Linear
                           preferred_element_type=jnp.float32) + c_ref[...]


@functools.partial(jax.jit, static_argnames=("num_classes",))
def chebnet_forward(x, a0, bmat, c_pad, *, num_classes):
    """x: [N0, Fin] node features.  Returns logits [num_classes]."""
    d_in = x.size                                            # N0 * Fin (= 96 here)
    d_in_pad = a0.shape[0]                                   # lane-padded contraction dim
    # Augmented, padded activation row: [8, d_in_pad]; row 0 holds vec(x) and a
    # constant 1.0 in lane d_in (pairs with the bias row baked into A0).
    x_pad = jnp.zeros((_SUBLANES, d_in_pad), jnp.float32)
    x_pad = x_pad.at[0, :d_in].set(x.reshape(-1).astype(jnp.float32))
    x_pad = x_pad.at[0, d_in].set(1.0)

    z = pl.pallas_call(
        _fused_forward_kernel,
        out_shape=jax.ShapeDtypeStruct((_SUBLANES, c_pad.shape[1]), jnp.float32),
        in_specs=[_VMEM, _VMEM, _VMEM, _VMEM],
        out_specs=_VMEM,
    )(x_pad, a0, bmat, c_pad)
    return z[0, :num_classes]


# ---------------------------------------------------------------------------
# Host-side (one-time) graph structure + operator folding
# ---------------------------------------------------------------------------

def ring_scaled_laplacian(n):
    """Dense L_hat = (2/lmax)(I - D^-1/2 A D^-1/2) - I = -D^-1/2 A D^-1/2 (ring)."""
    a = np.zeros((n, n), np.float32)
    idx = np.arange(n)
    a[idx, (idx + 1) % n] = 1.0
    a[(idx + 1) % n, idx] = 1.0
    dinv = 1.0 / np.sqrt(a.sum(axis=1))
    return (-(dinv[:, None] * a * dinv[None, :])).astype(np.float32)


def avg_pool_matrix(n_out, n_in):
    """Dense version of the sparse downscale matrix: average node pairs."""
    d = np.zeros((n_out, n_in), np.float32)
    for i in range(n_out):
        d[i, 2 * i] = 0.5
        d[i, 2 * i + 1] = 0.5
    return d


def cheb_basis(lhat, K):
    """Stacked Chebyshev operators T_k(L_hat), shape [K, N, N] (host constant)."""
    ts = [np.eye(lhat.shape[0], dtype=np.float32), lhat.astype(np.float32)]
    for _ in range(2, K):
        ts.append(2.0 * lhat @ ts[-1] - ts[-2])
    return np.stack(ts[:K], axis=0)


def _pad_to(n, m):
    return ((n + m - 1) // m) * m


def fold_operators(params, lhats, d_mats, K, lane=_LANE):
    """Fold static graph operators + module weights into two dense matrices.

    Exact algebra (no approximation):
      vec(pre-relu h0)[n*C0+c] = sum_{m,f} vec(x)[m*Fin+f] * A0[m*Fin+f, n*C0+c] + b0[c]
        with A0[(m,f),(n,c)]   = sum_k T_k(L0)[n,m] W0[k,f,c]
      z[j] = sum_{m,c} relu_h[m,c] * B[m*C0+c, j] + c_const[j]
        with B[(m,c),j] = sum_{k,n,c1} (T_k(L1) @ D0)[n,m] W1[k,c,c1] Wlin[j,n*C1+c1]
             c_const[j] = b_lin[j] + sum_{n,c1} Wlin[j,n*C1+c1] b1[c1]

    Padding / folding for the kernel:
      * contraction dim (N0*Fin) padded to a lane multiple; one extra row of A0
        carries the ChebConv_0 bias (paired with a 1.0 lane in the activation),
      * hidden dim (N0*C0) padded to a lane multiple (zero cols / zero rows),
      * class dim padded to a lane multiple so the output store is lane-dense.
    """
    (w0, b0), (w1, b1), (w_lin, b_lin) = params
    t0 = cheb_basis(lhats[0], K)                       # [K, N0, N0]
    t1 = cheb_basis(lhats[1], K)                       # [K, N1, N1]
    d0 = d_mats[0]                                     # [N1, N0]

    n0, fin, c0 = t0.shape[1], w0.shape[1], w0.shape[2]
    n1, c1 = t1.shape[1], w1.shape[2]
    ncls = w_lin.shape[0]

    # --- ChebConv_0 folded over all K taps: vec(x) -> vec(pre-ReLU h0) ---
    a0 = jnp.einsum('knm,kfc->mfnc', t0, w0).reshape(n0 * fin, n0 * c0)
    b0_rep = jnp.tile(b0, (n0,))                       # [N0*C0]

    # --- post-ReLU path (pool + ChebConv_1 + Linear), all linear -> one matrix ---
    td = jnp.einsum('knm,ml->knl', t1, d0)             # T_k(L1) @ D0   [K, N1, N0]
    wl3 = w_lin.reshape(ncls, n1, c1)                  # Wlin[j, n, c1]
    bmat = jnp.einsum('knm,kcd,jnd->mcj', td, w1, wl3).reshape(n0 * c0, ncls)
    c_const = b_lin + jnp.einsum('jnd,d->j', wl3, b1)  # [ncls]

    # --- pad for lane/sublane-dense kernel layout ---
    d_in = n0 * fin
    d_in_pad = _pad_to(d_in + 1, lane)                 # +1 for the bias lane
    h_dim = n0 * c0
    h_dim_pad = _pad_to(h_dim, lane)
    ncls_pad = _pad_to(ncls, lane)

    a0_pad = jnp.zeros((d_in_pad, h_dim_pad), jnp.float32)
    a0_pad = a0_pad.at[:d_in, :h_dim].set(a0)
    a0_pad = a0_pad.at[d_in, :h_dim].set(b0_rep)       # bias row (x_aug lane d_in == 1.0)

    bmat_pad = jnp.zeros((h_dim_pad, ncls_pad), jnp.float32)
    bmat_pad = bmat_pad.at[:h_dim, :ncls].set(bmat)

    c_pad = jnp.zeros((_SUBLANES, ncls_pad), jnp.float32)
    c_pad = c_pad.at[:, :ncls].set(jnp.broadcast_to(c_const, (_SUBLANES, ncls)))

    return a0_pad, bmat_pad, c_pad


def glorot(key, shape):
    fan_in, fan_out = shape[-2], shape[-1]
    s = np.sqrt(6.0 / (fan_in + fan_out))
    return jax.random.uniform(key, shape, jnp.float32, -s, s)


# ---------------------------------------------------------------------------
# Pure-JAX reference: the ORIGINAL per-layer math (Chebyshev recurrence)
# ---------------------------------------------------------------------------

def chebconv_ref(lhat, x, w, b, relu):
    K = w.shape[0]
    tx_prev = x
    acc = tx_prev @ w[0]
    tx_cur = lhat @ x
    acc = acc + tx_cur @ w[1]
    for k in range(2, K):
        tx_next = 2.0 * (lhat @ tx_cur) - tx_prev
        acc = acc + tx_next @ w[k]
        tx_prev, tx_cur = tx_cur, tx_next
    acc = acc + b[None, :]
    return jnp.maximum(acc, 0.0) if relu else acc


def forward_ref(x, params, lhats, d_mats):
    (w0, b0), (w1, b1), (w_lin, b_lin) = params
    h = chebconv_ref(jnp.asarray(lhats[0]), x, w0, b0, True)
    h = jnp.asarray(d_mats[0]) @ h
    h = chebconv_ref(jnp.asarray(lhats[1]), h, w1, b1, False)
    return w_lin @ h.reshape(-1) + b_lin


# ---------------------------------------------------------------------------

if __name__ == "__main__":
    # Module-consistent small configuration:
    #   param_conv_layers = [8, 16] -> conv dims [3, 8, 16], 2 ChebConv layers
    #   one downscale matrix D0: 32 nodes -> 16 nodes
    #   K = 6, num_classes = 4, linear in = 16 * 16
    N0, N1 = 32, 16
    K = 6
    FIN = 3
    C0, C1 = 8, 16
    NUM_CLASSES = 4

    key = jax.random.PRNGKey(0)
    kx, kw0, kb0, kw1, kb1, kwl, kbl = jax.random.split(key, 7)

    x = jax.random.normal(kx, (N0, FIN), jnp.float32)          # node xyz positions

    w0 = glorot(kw0, (K, FIN, C0))
    b0 = 0.01 * jax.random.normal(kb0, (C0,), jnp.float32)
    w1 = glorot(kw1, (K, C0, C1))
    b1 = 0.01 * jax.random.normal(kb1, (C1,), jnp.float32)
    w_lin = glorot(kwl, (NUM_CLASSES, N1 * C1))
    b_lin = 0.01 * jax.random.normal(kbl, (NUM_CLASSES,), jnp.float32)
    # TODO(synk): parameters_file / torch.load checkpoint loading intentionally
    # skipped; weights are deterministic in-script initialisations.

    params = ((w0, b0), (w1, b1), (w_lin, b_lin))
    lhats = (ring_scaled_laplacian(N0), ring_scaled_laplacian(N1))
    d_mats = (avg_pool_matrix(N1, N0),)

    # One-time operator folding (static graph + module parameters).
    a0, bmat, c_pad = fold_operators(params, lhats, d_mats, K)

    z = chebnet_forward(x, a0, bmat, c_pad, num_classes=NUM_CLASSES)
    z = jax.block_until_ready(z)

    z_ref = forward_ref(x, params, lhats, d_mats)
    np.testing.assert_allclose(np.asarray(z), np.asarray(z_ref),
                               rtol=1e-4, atol=1e-4)
    assert z.shape == (NUM_CLASSES,)
    print("KERNEL_OK")
</pallas_src>

<mosaic_0001>
module attributes {stable_mosaic.version = 11 : i64} {
  func.func @_fused_forward_kernel(%arg0: memref<8x128xf32, #tpu.memory_space<vmem>>, %arg1: memref<128x256xf32, #tpu.memory_space<vmem>>, %arg2: memref<256x128xf32, #tpu.memory_space<vmem>>, %arg3: memref<8x128xf32, #tpu.memory_space<vmem>>, %arg4: memref<8x128xf32, #tpu.memory_space<vmem>>) attributes {dimension_semantics = [], scalar_prefetch = 0 : i64, scratch_operands = 0 : i64, tpu.core_type = #tpu.core_type<tc>} {
    %c0 = arith.constant 0 : index
    %c0_0 = arith.constant 0 : index
    %0 = vector.load %arg0[%c0, %c0_0] : memref<8x128xf32, #tpu.memory_space<vmem>>, vector<8x128xf32>
    %c0_1 = arith.constant 0 : index
    %c0_2 = arith.constant 0 : index
    %1 = vector.load %arg1[%c0_1, %c0_2] : memref<128x256xf32, #tpu.memory_space<vmem>>, vector<128x256xf32>
    %cst = arith.constant dense<0.000000e+00> : vector<8x256xf32>
    %2 = tpu.matmul %0, %1, %cst {dimension_numbers = #tpu.dot_dimension_numbers<[1], [0], [0], [1], [0, 0, 1, 1], [], []>} : vector<8x128xf32>, vector<128x256xf32>, vector<8x256xf32> -> vector<8x256xf32>
    %cst_3 = arith.constant 0.000000e+00 : f32
    %3 = vector.broadcast %cst_3 : f32 to vector<8x256xf32>
    %4 = arith.maximumf %2, %3 : vector<8x256xf32>
    %c0_4 = arith.constant 0 : index
    %c0_5 = arith.constant 0 : index
    %5 = vector.load %arg2[%c0_4, %c0_5] : memref<256x128xf32, #tpu.memory_space<vmem>>, vector<256x128xf32>
    %cst_6 = arith.constant dense<0.000000e+00> : vector<8x128xf32>
    %6 = tpu.matmul %4, %5, %cst_6 {dimension_numbers = #tpu.dot_dimension_numbers<[1], [0], [0], [1], [0, 0, 1, 1], [], []>} : vector<8x256xf32>, vector<256x128xf32>, vector<8x128xf32> -> vector<8x128xf32>
    %c0_7 = arith.constant 0 : index
    %c0_8 = arith.constant 0 : index
    %7 = vector.load %arg3[%c0_7, %c0_8] : memref<8x128xf32, #tpu.memory_space<vmem>>, vector<8x128xf32>
    %8 = arith.addf %6, %7 : vector<8x128xf32>
    %c0_9 = arith.constant 0 : index
    %c0_10 = arith.constant 0 : index
    %9 = vector.load %arg4[%c0_9, %c0_10] : memref<8x128xf32, #tpu.memory_space<vmem>>, vector<8x128xf32>
    tpu.vector_store %arg4[%c0_9, %c0_10], %8 {strides = array<i32>} : memref<8x128xf32, #tpu.memory_space<vmem>>, vector<8x128xf32>,
    return
  }
}

</mosaic_0001>

<bundles_post_ra>
// kernel: chebnet_forward.1
= control target key start
LH: loop header
LB: loop body
LE: loop exit
PB: predicated region body
PF: predicated region fallthrough
CT: control target
= control target key end

     0   :  { %9 = vsyncpa [#allocation3], 0  ;;  %s308_s0 = inlined_call_operand.vmem [shape: f32[8,128], index: 0, kind: input, shape index: {}]   ;;  %s309_s1 = inlined_call_operand.hbm [shape: f32[128,256], index: 1, kind: input, shape index: {}]   ;;  %s310_s2 = inlined_call_operand.hbm [shape: f32[256,128], index: 2, kind: input, shape index: {}]   ;;  %s311_s3 = inlined_call_operand.vmem [shape: f32[8,128], index: 3, kind: input, shape index: {}]   ;;  %s312_s4 = inlined_call_operand.vmem [shape: f32[8,128], index: 4, kind: output, shape index: {}]  }
   0x1   :  { %s17_s17 = sshll.u32 %s309_s1, 4  ;;  %s18_s17 = int_to_ptr.hbm [resolvable:$true] %s17_s17 }
   0x2   :  { %10 = vsyncpa [#allocation5], 0  ;;  %s262_s18 = smov [#allocation2]   ;;  %s30_s22 = sshll.u32 %s310_s2, 4  ;;  %s31_s22 = int_to_ptr.hbm [resolvable:$true] %s30_s22 }
   0x3   :  { %s19_s19 = sshll.u32 %s262_s18, 4  ;;  %s263_s23 = smov 256   ;;  %s20_s19 = int_to_ptr.vmem [resolvable:$true] %s19_s19 }
   0x4   :  { %s264_s24 = smov 16   ;;  %s265_s25 = smov [#allocation4]  }
   0x5   :  { %25 = dma.hbm_to_vmem [thread:$0]  %s18_s17, 4096, %s20_s19, [#allocation3], %s263_s23, %s263_s23, %s264_s24  }
   0x6   :  { %s32_s26 = sshll.u32 %s265_s25, 4  ;;  %s266_s27 = smov 128   ;;  %s33_s26 = int_to_ptr.vmem [resolvable:$true] %s32_s26 }
   0x7   :  { %s267_s28 = smov 8  }
   0x8   :  { %38 = dma.hbm_to_vmem [thread:$0]  %s31_s22, 4096, %s33_s26, [#allocation5], %s266_s27, %s266_s27, %s267_s28  }
   0x9   :  { %258 = dma.done.wait [#allocation3], 4096  }
   0xa   :  { %259 = vsyncadd [#allocation3], 4294963200 }
   0xb   :  { %260 = dma.done.wait [#allocation5], 4096  }
   0xc   :  { %261 = vsyncadd [#allocation5], 4294963200  ;;  %v80_v0 = vld [vmem:[#allocation2 + $0xf0] sm:$0xff]  ;;  %v78_v1 = vld [vmem:[#allocation2 + $0xe0] sm:$0xff] }
   0xd   :  { %v81_v2 = vld [vmem:[#allocation2 + $0xf8] sm:$0xff]  ;;  %82 = vmatpush.msra.mxu0 %v80_v0  ;;  %v79_v3 = vld [vmem:[#allocation2 + $0xe8] sm:$0xff]  ;;  %v76_v4 = vld [vmem:[#allocation2 + $0xd0] sm:$0xff] }
   0xe   :  { %102 = vmatpush.msra.mxu1 %v81_v2  ;;  %v77_v5 = vld [vmem:[#allocation2 + $0xd8] sm:$0xff]  ;;  %v74_v6 = vld [vmem:[#allocation2 + $0xc0] sm:$0xff]  ;;  %v75_v7 = vld [vmem:[#allocation2 + $0xc8] sm:$0xff] }
   0xf   :  { %83 = vmatpush.msra.mxu0 %v78_v1  ;;  %v72_v8 = vld [vmem:[#allocation2 + $0xb0] sm:$0xff]  ;;  %v73_v9 = vld [vmem:[#allocation2 + $0xb8] sm:$0xff]  ;;  %v70_v10 = vld [vmem:[#allocation2 + $0xa0] sm:$0xff] }
  0x10   :  { %103 = vmatpush.msra.mxu1 %v79_v3  ;;  %v71_v11 = vld [vmem:[#allocation2 + $0xa8] sm:$0xff]  ;;  %v68_v12 = vld [vmem:[#allocation2 + $0x90] sm:$0xff]  ;;  %v69_v13 = vld [vmem:[#allocation2 + $0x98] sm:$0xff] }
  0x11   :  { %84 = vmatpush.msra.mxu0 %v76_v4  ;;  %v139_v14 = vld [vmem:[#allocation4 + $0x78] sm:$0xff]  ;;  %v138_v15 = vld [vmem:[#allocation4 + $0x70] sm:$0xff]  ;;  %v66_v17 = vld [vmem:[#allocation2 + $0x80] sm:$0xff] }
  0x12   :  { %104 = vmatpush.msra.mxu1 %v77_v5  ;;  %v155_v16 = vld [vmem:[#allocation4 + $0xf8] sm:$0xff]  ;;  %v67_v18 = vld [vmem:[#allocation2 + $0x88] sm:$0xff]  ;;  %157 = vmatpush.msra.mxu2 %v139_v14  ;;  %v154_v19 = vld [vmem:[#allocation4 + $0xf0] sm:$0xff] }
  0x13   :  { %85 = vmatpush.msra.mxu0 %v74_v6  ;;  %177 = vmatpush.msra.mxu3 %v155_v16  ;;  %v137_v20 = vld [vmem:[#allocation4 + $0x68] sm:$0xff]  ;;  %v64_v22 = vld [vmem:[#allocation2 + $0x70] sm:$0xff]  ;;  %v65_v23 = vld [vmem:[#allocation2 + $0x78] sm:$0xff] }
  0x14   :  { %105 = vmatpush.msra.mxu1 %v75_v7  ;;  %v153_v21 = vld [vmem:[#allocation4 + $0xe8] sm:$0xff]  ;;  %158 = vmatpush.msra.mxu2 %v138_v15  ;;  %v136_v24 = vld [vmem:[#allocation4 + $0x60] sm:$0xff]  ;;  %v135_v28 = vld [vmem:[#allocation4 + $0x58] sm:$0xff] }
  0x15   :  { %86 = vmatpush.msra.mxu0 %v72_v8  ;;  %178 = vmatpush.msra.mxu3 %v154_v19  ;;  %v152_v25 = vld [vmem:[#allocation4 + $0xe0] sm:$0xff]  ;;  %v63_v27 = vld [vmem:[#allocation2 + $0x68] sm:$0xff]  ;;  %v151_v29 = vld [vmem:[#allocation4 + $0xd8] sm:$0xff] }
  0x16   :  { %106 = vmatpush.msra.mxu1 %v73_v9  ;;  %v62_v26 = vld [vmem:[#allocation2 + $0x60] sm:$0xff]  ;;  %159 = vmatpush.msra.mxu2 %v137_v20  ;;  %v60_v30 = vld [vmem:[#allocation2 + $0x50] sm:$0xff]  ;;  %v61_v31 = vld [vmem:[#allocation2 + $0x58] sm:$0xff] }
  0x17   :  { %87 = vmatpush.msra.mxu0 %v70_v10  ;;  %179 = vmatpush.msra.mxu3 %v153_v21  ;;  %v134_v32 = vld [vmem:[#allocation4 + $0x50] sm:$0xff]  ;;  %v58_v34 = vld [vmem:[#allocation2 + $0x40] sm:$0xff]  ;;  %v59_v35 = vld [vmem:[#allocation2 + $0x48] sm:$0xff] }
  0x18   :  { %107 = vmatpush.msra.mxu1 %v71_v11  ;;  %160 = vmatpush.msra.mxu2 %v136_v24  ;;  %v150_v33 = vld [vmem:[#allocation4 + $0xd0] sm:$0xff]  ;;  %v133_v36 = vld [vmem:[#allocation4 + $0x48] sm:$0xff]  ;;  %v57_v39 = vld [vmem:[#allocation2 + $0x38] sm:$0xff] }
  0x19   :  { %88 = vmatpush.msra.mxu0 %v68_v12  ;;  %180 = vmatpush.msra.mxu3 %v152_v25  ;;  %v149_v37 = vld [vmem:[#allocation4 + $0xc8] sm:$0xff]  ;;  %v56_v38 = vld [vmem:[#allocation2 + $0x30] sm:$0xff]  ;;  %v132_v40 = vld [vmem:[#allocation4 + $0x40] sm:$0xff] }
  0x1a   :  { %108 = vmatpush.msra.mxu1 %v69_v13  ;;  %161 = vmatpush.msra.mxu2 %v135_v28  ;;  %v148_v41 = vld [vmem:[#allocation4 + $0xc0] sm:$0xff]  ;;  %v55_v43 = vld [vmem:[#allocation2 + $0x28] sm:$0xff]  ;;  %v131_v44 = vld [vmem:[#allocation4 + $0x38] sm:$0xff] }
  0x1b   :  { %89 = vmatpush.msra.mxu0 %v66_v17  ;;  %181 = vmatpush.msra.mxu3 %v151_v29  ;;  %v54_v42 = vld [vmem:[#allocation2 + $0x20] sm:$0xff]  ;;  %v147_v45 = vld [vmem:[#allocation4 + $0xb8] sm:$0xff]  ;;  %v52_v46 = vld [vmem:[#allocation2 + $0x10] sm:$0xff] }
  0x1c   :  { %109 = vmatpush.msra.mxu1 %v67_v18  ;;  %162 = vmatpush.msra.mxu2 %v134_v32  ;;  %v53_v47 = vld [vmem:[#allocation2 + $0x18] sm:$0xff]  ;;  %v130_v48 = vld [vmem:[#allocation4 + $0x30] sm:$0xff]  ;;  %v50_v50 = vld [vmem:[#allocation2] sm:$0xff] }
  0x1d   :  { %90 = vmatpush.msra.mxu0 %v64_v22  ;;  %182 = vmatpush.msra.mxu3 %v150_v33  ;;  %v146_v49 = vld [vmem:[#allocation4 + $0xb0] sm:$0xff]  ;;  %v51_v51 = vld [vmem:[#allocation2 + $0x8] sm:$0xff]  ;;  %v49_v52 = vld [vmem:[%s308_s0] sm:$0xff] }
  0x1e   :  { %110 = vmatpush.msra.mxu1 %v65_v23  ;;  %163 = vmatpush.msra.mxu2 %v133_v36  ;;  %v129_v53 = vld [vmem:[#allocation4 + $0x28] sm:$0xff]  ;;  %v128_v55 = vld [vmem:[#allocation4 + $0x20] sm:$0xff]  ;;  %v127_v57 = vld [vmem:[#allocation4 + $0x18] sm:$0xff] }
  0x1f   :  { %91 = vmatpush.msra.mxu0 %v62_v26  ;;  %183 = vmatpush.msra.mxu3 %v149_v37  ;;  %v145_v54 = vld [vmem:[#allocation4 + $0xa8] sm:$0xff]  ;;  %v144_v56 = vld [vmem:[#allocation4 + $0xa0] sm:$0xff]  ;;  %v143_v58 = vld [vmem:[#allocation4 + $0x98] sm:$0xff] }
  0x20   :  { %111 = vmatpush.msra.mxu1 %v63_v27  ;;  %164 = vmatpush.msra.mxu2 %v132_v40  ;;  %v126_v59 = vld [vmem:[#allocation4 + $0x10] sm:$0xff]  ;;  %v125_v60 = vld [vmem:[#allocation4 + $0x8] sm:$0xff]  ;;  %v124_v62 = vld [vmem:[#allocation4] sm:$0xff] }
  0x21   :  { %92 = vmatpush.msra.mxu0 %v60_v30  ;;  %184 = vmatpush.msra.mxu3 %v148_v41  ;;  %v142_v61 = vld [vmem:[#allocation4 + $0x90] sm:$0xff]  ;;  %v141_v63 = vld [vmem:[#allocation4 + $0x88] sm:$0xff]  ;;  %v140_v0 = vld [vmem:[#allocation4 + $0x80] sm:$0xff] }
  0x22   :  { %112 = vmatpush.msra.mxu1 %v61_v31  ;;  %165 = vmatpush.msra.mxu2 %v131_v44  ;;  %v156_v5 = vld [vmem:[%s311_s3] sm:$0xff] }
  0x23   :  { %93 = vmatpush.msra.mxu0 %v58_v34  ;;  %185 = vmatpush.msra.mxu3 %v147_v45 }
  0x24   :  { %113 = vmatpush.msra.mxu1 %v59_v35  ;;  %166 = vmatpush.msra.mxu2 %v130_v48 }
  0x25   :  { %94 = vmatpush.msra.mxu0 %v56_v38  ;;  %186 = vmatpush.msra.mxu3 %v146_v49 }
  0x26   :  { %114 = vmatpush.msra.mxu1 %v57_v39  ;;  %167 = vmatpush.msra.mxu2 %v129_v53 }
  0x27   :  { %95 = vmatpush.msra.mxu0 %v54_v42  ;;  %187 = vmatpush.msra.mxu3 %v145_v54 }
  0x28   :  { %115 = vmatpush.msra.mxu1 %v55_v43  ;;  %168 = vmatpush.msra.mxu2 %v128_v55 }
  0x29   :  { %96 = vmatpush.msra.mxu0 %v52_v46  ;;  %188 = vmatpush.msra.mxu3 %v144_v56 }
  0x2a   :  { %116 = vmatpush.msra.mxu1 %v53_v47  ;;  %169 = vmatpush.msra.mxu2 %v127_v57 }
  0x2b   :  { %97 = vmatpush.msra.mxu0 %v50_v50  ;;  %189 = vmatpush.msra.mxu3 %v143_v58 }
  0x2c   :  { %117 = vmatpush.msra.mxu1 %v51_v51  ;;  %98 = vmatmul.f32.vlgmr.msra.gmra.mxu0 %v49_v52 }
  0x2d   :  { %118 = vmatmul.f32.vlgmr.msra.gmra.mxu1 %v49_v52  ;;  %170 = vmatpush.msra.mxu2 %v126_v59 }
  0x2e   :  { %190 = vmatpush.msra.mxu3 %v142_v61 }
  0x2f   :  { %171 = vmatpush.msra.mxu2 %v125_v60 }
  0x30   :  { %191 = vmatpush.msra.mxu3 %v141_v63 }
  0x31   :  { %172 = vmatpush.msra.mxu2 %v124_v62 }
  0x32   :  { %192 = vmatpush.msra.mxu3 %v140_v0 }
  0xa9   :  { %v99_v1 = vpop.f32.mrf.mxu0 }
  0xaa   :  { %v119_v2 = vpop.f32.mrf.mxu1  ;;  %v122_v3 = vmax.f32 %v99_v1, 0.0 }
  0xab   :  { %v123_v4 = vmax.f32 %v119_v2, 0.0 }
  0xac   :  { %173 = vmatmul.f32.vlgmr.msra.gmra.mxu2 %v122_v3 }
  0xad   :  { %193 = vmatmul.f32.vlgmr.msra.gmra.mxu3 %v123_v4 }
 0x12f   :  { %v174_v6 = vpop.f32.mrf.mxu2 }
 0x130   :  { %v194_v7 = vpop.f32.mrf.mxu3  ;;  %v175_v8 = vadd.f32 %v174_v6, %v156_v5 }
 0x132   :  { %v195_v9 = vadd.f32 %v194_v7, %v175_v8 }
 0x134   :  { %197 = vst [vmem:[%s312_s4] sm:$0xff] %v195_v9 }
 0x135   :  { %202 = vsyncpa [#allocation3], 1 }
 0x136   :  { %203 = vsyncpa [#allocation5], 1 }

</bundles_post_ra>
